<compile_context>
chip_gen: v6e
topology: v6e:2x2x1
jax: 0.10.0
libtpu: 0.0.40
codegen_flags: <defaults>
</compile_context>

<pallas_src>
import functools

import jax
import jax.numpy as jnp
from jax.experimental import pallas as pl
from jax.experimental.pallas import tpu as pltpu

HIDDEN1 = 256
HIDDEN2 = 128

_SCRATCH_HEADROOM = 1 << 20  # Mosaic internal scratch / small constants


def _round_up(x, m):
    return ((x + m - 1) // m) * m


def _tpu_config():
    """Best-effort probe -> (vmem_budget, vmem_limit, two_tensorcores, is_v5e)."""
    vmem = 64 << 20
    try:
        vmem = int(getattr(pltpu.get_tpu_info(), "vmem_capacity_bytes", vmem))
    except Exception:
        pass
    kind = ""
    try:
        kind = jax.devices()[0].device_kind.lower()
    except Exception:
        pass
    # v7x: 64 MiB VMEM per TensorCore, 2 TCs/chip.  v5e/v6e: 128 MiB, 1 TC.
    two_cores = ("v7" in kind) or (vmem <= (96 << 20))
    is_v5e = ("v5" in kind) and (("lite" in kind) or ("v5e" in kind))
    budget = int(vmem * 0.60)
    limit = int(vmem * 0.75)
    if two_cores:  # keep per-TensorCore numbers safe on v7x (64 MiB physical)
        budget = min(budget, 40 << 20)
        limit = min(limit, 48 << 20)
    return budget, limit, two_cores, is_v5e


def _vmem_single(tb, d, x_isz, w_isz, o_isz):
    """VMEM footprint of the single-K-step kernel (double-buffered tiles)."""
    return (2 * tb * d * x_isz                  # x tile (2 buffers)
            + 2 * d * HIDDEN1 * w_isz           # W1 resident (2 buffers)
            + 2 * HIDDEN1 * HIDDEN2 * w_isz     # W2 resident
            + 2 * tb * HIDDEN2 * o_isz          # output tile
            + tb * HIDDEN1 * 4                  # fp32 h intermediate
            + tb * HIDDEN2 * 4                  # fp32 y intermediate
            + _SCRATCH_HEADROOM)


def _vmem_ktiled(tb, tk, x_isz, w_isz, o_isz):
    """VMEM footprint of the K-tiled kernel."""
    return (2 * tb * tk * x_isz
            + 2 * tk * HIDDEN1 * w_isz
            + 2 * HIDDEN1 * HIDDEN2 * w_isz
            + 2 * tb * HIDDEN2 * o_isz
            + tb * HIDDEN1 * 4                  # fp32 accumulator scratch
            + tb * HIDDEN2 * 4
            + _SCRATCH_HEADROOM)


def _mlp_kernel_single(x_ref, w1_ref, b1_ref, w2_ref, b2_ref, o_ref):
    # Single K step: no accumulator scratch, no init/finalize phases.
    # fp32 MXU accumulation; bias adds / ReLUs stay in-kernel (VPU filler
    # hidden under MXU + DMA slack).
    h = jnp.dot(x_ref[...].astype(w1_ref.dtype), w1_ref[...],
                preferred_element_type=jnp.float32)
    h = jnp.maximum(h + b1_ref[...], 0.0)                      # (tb,256)+(1,256)
    # NOTE: casting h to the weight dtype (bf16) is a small, deliberate
    # precision loss vs the fp32 PyTorch reference (fp32 accumulation kept).
    y = jnp.dot(h.astype(w2_ref.dtype), w2_ref[...],
                preferred_element_type=jnp.float32)
    o_ref[...] = jnp.maximum(y + b2_ref[...], 0.0).astype(o_ref.dtype)


def _mlp_kernel_ktiled(x_ref, w1_ref, b1_ref, w2_ref, b2_ref, o_ref, acc_ref,
                       *, d_total, tk):
    k = pl.program_id(1)

    @pl.when(k == 0)
    def _init():
        acc_ref[...] = jnp.zeros_like(acc_ref)

    x = x_ref[...].astype(w1_ref.dtype)
    w1 = w1_ref[...]
    if d_total % tk != 0:
        # Ragged last K tile: zero the out-of-bounds tail of both operands so
        # partial-block garbage never reaches the accumulator.  The compare is
        # all-true (a no-op) on every tile except the last.
        start = k * tk
        col = jax.lax.broadcasted_iota(jnp.int32, x.shape, 1) + start
        x = jnp.where(col < d_total, x, jnp.zeros_like(x))
        row = jax.lax.broadcasted_iota(jnp.int32, w1.shape, 0) + start
        w1 = jnp.where(row < d_total, w1, jnp.zeros_like(w1))

    acc_ref[...] += jnp.dot(x, w1, preferred_element_type=jnp.float32)

    @pl.when(k == pl.num_programs(1) - 1)
    def _finalize():
        h = jnp.maximum(acc_ref[...] + b1_ref[...], 0.0)
        y = jnp.dot(h.astype(w2_ref.dtype), w2_ref[...],
                    preferred_element_type=jnp.float32)
        o_ref[...] = jnp.maximum(y + b2_ref[...], 0.0).astype(o_ref.dtype)


@functools.partial(jax.jit, static_argnames=("block_b", "block_d", "out_dtype"))
def global_logistic_forward(x, w1, b1, w2, b2, *, block_b=None, block_d=None,
                            out_dtype=None):
    """x: (B, input_dim) -> (B, 128).

    Weights are transposed vs torch nn.Linear: w1 (input_dim, 256),
    w2 (256, 128) — preferably bf16 (fp32 accumulation kept on the MXU).
    b1 (256,), b2 (128,) fp32.  x may be fp32 or bf16; pass bf16 from the
    producer when possible (this wrapper never re-casts / copies x in HBM).
    NOTE: with bf16 weights, x and the hidden activation are rounded to bf16
    before each matmul — a small, documented deviation from the fp32 torch ref.
    block_d (if given) must be a multiple of 128 and forces the K-tiled path.
    """
    B, D = x.shape
    out_dtype = x.dtype if out_dtype is None else jnp.dtype(out_dtype)
    x_isz = jnp.dtype(x.dtype).itemsize
    w_isz = jnp.dtype(w1.dtype).itemsize
    o_isz = jnp.dtype(out_dtype).itemsize

    budget, vmem_limit, two_cores, is_v5e = _tpu_config()

    # Sub-32-bit activations pack (16,128) per vreg: keep the batch tile >= 16.
    min_tb = 16 if min(x_isz, o_isz) < 4 else 8
    if block_b is None:
        block_b = 512 if two_cores else 2048
    block_b = max(min_tb, _round_up(block_b, min_tb))

    # --- batch tile -----------------------------------------------------------
    tb = min(block_b, _round_up(B, min_tb))
    # Split the batch tile only on two-TensorCore chips (v7x) so both TCs get
    # work; on v5e/v6e the split just adds per-step overhead.
    if two_cores and B >= 2 * min_tb and tb >= B:
        tb = _round_up(pl.cdiv(B, 2), min_tb)

    b1_2d = b1.reshape(1, HIDDEN1).astype(jnp.float32)
    b2_2d = b2.reshape(1, HIDDEN2).astype(jnp.float32)

    # Deeper x buffering only on v5e (lowest HBM BW, most DMA jitter).
    # TODO(synk): verify with an xprof trace that input DMA was exposed on v5e.
    x_kwargs = {"pipeline_mode": pl.Buffered(3)} if is_v5e else {}

    single_k = (block_d is None
                and _vmem_single(min_tb, D, x_isz, w_isz, o_isz) <= budget)

    if single_k:
        # W1 fully resident; DMA'd once for the whole call.
        while tb > min_tb and _vmem_single(tb, D, x_isz, w_isz, o_isz) > budget:
            tb = max(min_tb, _round_up(tb // 2, min_tb))
        grid = (pl.cdiv(B, tb),)
        kernel = _mlp_kernel_single
        in_specs = [
            pl.BlockSpec((tb, D), lambda i: (i, 0), **x_kwargs),       # x tile
            pl.BlockSpec((D, HIDDEN1), lambda i: (0, 0)),              # W1
            pl.BlockSpec((1, HIDDEN1), lambda i: (0, 0)),              # b1
            pl.BlockSpec((HIDDEN1, HIDDEN2), lambda i: (0, 0)),        # W2
            pl.BlockSpec((1, HIDDEN2), lambda i: (0, 0)),              # b2
        ]
        out_specs = pl.BlockSpec((tb, HIDDEN2), lambda i: (i, 0))
        scratch_shapes = []
        dim_sem = ("parallel",)
    else:
        if block_d is not None:
            tk = block_d
        else:
            tk = None
            for cand in (2048, 1024, 512, 256, 128):
                if D % cand == 0:
                    tk = cand
                    break
            if tk is None:
                tk = 512                       # ragged tail -> masked in-kernel
        # Budget: shrink the K tile first — a big batch tile amortizes the W1
        # re-stream (128/tb extra HBM traffic) and the output writebacks.
        while tk > 128 and _vmem_ktiled(tb, tk, x_isz, w_isz, o_isz) > budget:
            tk = max(128, tk // 2)
        while tb > min_tb and _vmem_ktiled(tb, tk, x_isz, w_isz, o_isz) > budget:
            tb = max(min_tb, _round_up(tb // 2, min_tb))
        grid = (pl.cdiv(B, tb), pl.cdiv(D, tk))
        kernel = functools.partial(_mlp_kernel_ktiled, d_total=D, tk=tk)
        in_specs = [
            pl.BlockSpec((tb, tk), lambda i, k: (i, k), **x_kwargs),   # x tile
            pl.BlockSpec((tk, HIDDEN1), lambda i, k: (k, 0)),          # W1 tile
            pl.BlockSpec((1, HIDDEN1), lambda i, k: (0, 0)),           # b1
            pl.BlockSpec((HIDDEN1, HIDDEN2), lambda i, k: (0, 0)),     # W2
            pl.BlockSpec((1, HIDDEN2), lambda i, k: (0, 0)),           # b2
        ]
        out_specs = pl.BlockSpec((tb, HIDDEN2), lambda i, k: (i, 0))
        scratch_shapes = [pltpu.VMEM((tb, HIDDEN1), jnp.float32)]
        dim_sem = ("parallel", "arbitrary")

    return pl.pallas_call(
        kernel,
        out_shape=jax.ShapeDtypeStruct((B, HIDDEN2), out_dtype),
        grid=grid,
        in_specs=in_specs,
        out_specs=out_specs,
        scratch_shapes=scratch_shapes,
        compiler_params=pltpu.CompilerParams(
            dimension_semantics=dim_sem,
            vmem_limit_bytes=vmem_limit,
        ),
    )(x, w1, b1_2d, w2, b2_2d)


def init_params(key, input_dim, dtype=jnp.float32):
    """Deterministic PyTorch-style (uniform +/- 1/sqrt(fan_in)) init."""
    k1, k2, k3, k4 = jax.random.split(key, 4)
    lim1 = 1.0 / jnp.sqrt(input_dim)
    lim2 = 1.0 / jnp.sqrt(HIDDEN1)
    w1 = jax.random.uniform(k1, (input_dim, HIDDEN1), dtype, -lim1, lim1)
    b1 = jax.random.uniform(k2, (HIDDEN1,), dtype, -lim1, lim1)
    w2 = jax.random.uniform(k3, (HIDDEN1, HIDDEN2), dtype, -lim2, lim2)
    b2 = jax.random.uniform(k4, (HIDDEN2,), dtype, -lim2, lim2)
    return w1, b1, w2, b2


def _reference(x, w1, b1, w2, b2):
    h = jnp.maximum(x @ w1 + b1, 0.0)
    return jnp.maximum(h @ w2 + b2, 0.0)


if __name__ == "__main__":
    key = jax.random.PRNGKey(0)
    k_x, k_p, k_x2, k_p2 = jax.random.split(key, 4)

    # --- test 1: single-K fast path, ragged batch (no wrapper padding) -------
    batch, input_dim = 20, 32
    x = jax.random.normal(k_x, (batch, input_dim), jnp.float32)
    w1, b1, w2, b2 = init_params(k_p, input_dim)
    # Weights fed in bf16 (half the weight DMA, native bf16 MXU rate);
    # fp32 accumulation is kept inside the kernel.
    w1_bf, w2_bf = w1.astype(jnp.bfloat16), w2.astype(jnp.bfloat16)

    out = global_logistic_forward(x, w1_bf, b1, w2_bf, b2, block_b=16)
    out = jax.block_until_ready(out)
    ref = _reference(x, w1_bf.astype(jnp.float32), b1,
                     w2_bf.astype(jnp.float32), b2)
    assert out.shape == (batch, HIDDEN2), out.shape
    assert jnp.allclose(out, ref, atol=2e-2, rtol=2e-2), (
        float(jnp.max(jnp.abs(out - ref))))

    # --- test 2: forced K-tiled path with a ragged (masked) last K tile ------
    batch2, input_dim2 = 12, 160
    x2 = jax.random.normal(k_x2, (batch2, input_dim2), jnp.float32)
    w1b, b1b, w2b, b2b = init_params(k_p2, input_dim2)
    w1b_bf, w2b_bf = w1b.astype(jnp.bfloat16), w2b.astype(jnp.bfloat16)

    out2 = global_logistic_forward(x2, w1b_bf, b1b, w2b_bf, b2b,
                                   block_b=8, block_d=128)
    out2 = jax.block_until_ready(out2)
    ref2 = _reference(x2, w1b_bf.astype(jnp.float32), b1b,
                      w2b_bf.astype(jnp.float32), b2b)
    assert out2.shape == (batch2, HIDDEN2), out2.shape
    assert jnp.allclose(out2, ref2, atol=2e-2, rtol=2e-2), (
        float(jnp.max(jnp.abs(out2 - ref2))))

    print("KERNEL_OK")
</pallas_src>

<mosaic_0001>
module attributes {stable_mosaic.version = 11 : i64} {
  func.func @_mlp_kernel_single(%arg0: i32, %arg1: memref<16x32xf32, #tpu.memory_space<vmem>>, %arg2: memref<32x256xbf16, #tpu.memory_space<vmem>>, %arg3: memref<1x256xf32, #tpu.memory_space<vmem>>, %arg4: memref<256x128xbf16, #tpu.memory_space<vmem>>, %arg5: memref<1x128xf32, #tpu.memory_space<vmem>>, %arg6: memref<16x128xf32, #tpu.memory_space<vmem>>) attributes {dimension_semantics = [#tpu.dimension_semantics<parallel>], iteration_bounds = array<i64: 2>, scalar_prefetch = 0 : i64, scratch_operands = 0 : i64, tpu.core_type = #tpu.core_type<tc>, window_params = [{transform_indices = @transform_0, window_bounds = array<i64: 16, 32>}, {pipeline_mode = #tpu.pipeline_mode<synchronous>, transform_indices = @transform_1, window_bounds = array<i64: 32, 256>}, {pipeline_mode = #tpu.pipeline_mode<synchronous>, transform_indices = @transform_2, window_bounds = array<i64: 1, 256>}, {pipeline_mode = #tpu.pipeline_mode<synchronous>, transform_indices = @transform_3, window_bounds = array<i64: 256, 128>}, {pipeline_mode = #tpu.pipeline_mode<synchronous>, transform_indices = @transform_4, window_bounds = array<i64: 1, 128>}, {transform_indices = @transform_5, window_bounds = array<i64: 16, 128>}]} {
    %c0 = arith.constant 0 : index
    %c0_0 = arith.constant 0 : index
    %0 = vector.load %arg1[%c0, %c0_0] : memref<16x32xf32, #tpu.memory_space<vmem>>, vector<16x32xf32>
    %1 = arith.truncf %0 : vector<16x32xf32> to vector<16x32xbf16>
    %c0_1 = arith.constant 0 : index
    %c0_2 = arith.constant 0 : index
    %2 = vector.load %arg2[%c0_1, %c0_2] : memref<32x256xbf16, #tpu.memory_space<vmem>>, vector<32x256xbf16>
    %cst = arith.constant dense<0.000000e+00> : vector<16x256xf32>
    %3 = tpu.matmul %1, %2, %cst {dimension_numbers = #tpu.dot_dimension_numbers<[1], [0], [0], [1], [0, 0, 1, 1], [], []>} : vector<16x32xbf16>, vector<32x256xbf16>, vector<16x256xf32> -> vector<16x256xf32>
    %c0_3 = arith.constant 0 : index
    %c0_4 = arith.constant 0 : index
    %4 = vector.load %arg3[%c0_3, %c0_4] : memref<1x256xf32, #tpu.memory_space<vmem>>, vector<1x256xf32>
    %5 = vector.broadcast %4 : vector<1x256xf32> to vector<16x256xf32>
    %6 = arith.addf %3, %5 : vector<16x256xf32>
    %cst_5 = arith.constant 0.000000e+00 : f32
    %7 = vector.broadcast %cst_5 : f32 to vector<16x256xf32>
    %8 = arith.maximumf %6, %7 : vector<16x256xf32>
    %9 = arith.truncf %8 : vector<16x256xf32> to vector<16x256xbf16>
    %c0_6 = arith.constant 0 : index
    %c0_7 = arith.constant 0 : index
    %10 = vector.load %arg4[%c0_6, %c0_7] : memref<256x128xbf16, #tpu.memory_space<vmem>>, vector<256x128xbf16>
    %cst_8 = arith.constant dense<0.000000e+00> : vector<16x128xf32>
    %11 = tpu.matmul %9, %10, %cst_8 {dimension_numbers = #tpu.dot_dimension_numbers<[1], [0], [0], [1], [0, 0, 1, 1], [], []>} : vector<16x256xbf16>, vector<256x128xbf16>, vector<16x128xf32> -> vector<16x128xf32>
    %c0_9 = arith.constant 0 : index
    %c0_10 = arith.constant 0 : index
    %12 = vector.load %arg5[%c0_9, %c0_10] : memref<1x128xf32, #tpu.memory_space<vmem>>, vector<1x128xf32>
    %13 = vector.broadcast %12 : vector<1x128xf32> to vector<16x128xf32>
    %14 = arith.addf %11, %13 : vector<16x128xf32>
    %cst_11 = arith.constant 0.000000e+00 : f32
    %15 = vector.broadcast %cst_11 : f32 to vector<16x128xf32>
    %16 = arith.maximumf %14, %15 : vector<16x128xf32>
    %c0_12 = arith.constant 0 : index
    %c0_13 = arith.constant 0 : index
    %17 = vector.load %arg6[%c0_12, %c0_13] : memref<16x128xf32, #tpu.memory_space<vmem>>, vector<16x128xf32>
    tpu.vector_store %arg6[%c0_12, %c0_13], %16 {strides = array<i32>} : memref<16x128xf32, #tpu.memory_space<vmem>>, vector<16x128xf32>,
    return
  }
  func.func @transform_0(%arg0: i32) -> (i32, i32) {
    %c0_i32 = arith.constant 0 : i32
    %c0_i32_0 = arith.constant 0 : i32
    return %arg0, %c0_i32 : i32, i32
  }
  func.func @transform_1(%arg0: i32) -> (i32, i32) {
    %c0_i32 = arith.constant 0 : i32
    %c0_i32_0 = arith.constant 0 : i32
    %c0_i32_1 = arith.constant 0 : i32
    return %c0_i32, %c0_i32_0 : i32, i32
  }
  func.func @transform_2(%arg0: i32) -> (i32, i32) {
    %c0_i32 = arith.constant 0 : i32
    %c0_i32_0 = arith.constant 0 : i32
    %c0_i32_1 = arith.constant 0 : i32
    return %c0_i32, %c0_i32_0 : i32, i32
  }
  func.func @transform_3(%arg0: i32) -> (i32, i32) {
    %c0_i32 = arith.constant 0 : i32
    %c0_i32_0 = arith.constant 0 : i32
    %c0_i32_1 = arith.constant 0 : i32
    return %c0_i32, %c0_i32_0 : i32, i32
  }
  func.func @transform_4(%arg0: i32) -> (i32, i32) {
    %c0_i32 = arith.constant 0 : i32
    %c0_i32_0 = arith.constant 0 : i32
    %c0_i32_1 = arith.constant 0 : i32
    return %c0_i32, %c0_i32_0 : i32, i32
  }
  func.func @transform_5(%arg0: i32) -> (i32, i32) {
    %c0_i32 = arith.constant 0 : i32
    %c0_i32_0 = arith.constant 0 : i32
    return %arg0, %c0_i32 : i32, i32
  }
}

</mosaic_0001>

<bundles_post_ra>
// kernel: global_logistic_forward.1
= control target key start
LH: loop header
LB: loop body
LE: loop exit
PB: predicated region body
PF: predicated region fallthrough
CT: control target
= control target key end

     0   :  { %10 = vsyncpa [#allocation3], 0  ;;  %s1249_s0 = inlined_call_operand.hbm [shape: f32[20,32], index: 0, kind: input, shape index: {}]   ;;  %s1250_s1 = inlined_call_operand.hbm [shape: bf16[32,256], index: 1, kind: input, shape index: {}]   ;;  %s1251_s2 = inlined_call_operand.vmem [shape: f32[1,256], index: 2, kind: input, shape index: {}]   ;;  %s1252_s3 = inlined_call_operand.hbm [shape: bf16[256,128], index: 3, kind: input, shape index: {}]   ;;  %s1253_s4 = inlined_call_operand.vmem [shape: f32[1,128], index: 4, kind: input, shape index: {}]   ;;  %s1254_s5 = inlined_call_operand.hbm [shape: f32[20,128], index: 5, kind: output, shape index: {}]  }
   0x1   :  { %12 = vsyncpa [#allocation3 + $0x1], 0 }
   0x2   :  { %13 = vsyncpa [#allocation6], 0 }
   0x3   :  { %14 = vsyncpa [#allocation4], 0 }
   0x4   :  { %16 = vsyncpa [#allocation4 + $0x1], 0  ;;  %s1027_s18 = smov 0   ;;  %s1029_s19 = smov 0  }
   0x5   :  { %s1031_s20 = smov 0   ;;  %s1033_s21 = smov 0  }
   0x6 LB: > { %s1048_s22 = sadd.s32 4294967295, %s982_s21   ;;  %s673_s23 = sadd.s32 4294967294, %s982_s21   ;;  %s982_s21 = sphi %s1033_s21, %s1271_s21   ;;  %s978_s20 = sphi %s1031_s20, %s1270_s20   ;;  %s974_s19 = sphi %s1029_s19, %s1269_s19   ;;  %s970_s18 = sphi %s1027_s18, %s1268_s18  }
   0x7   : > { %s1052_s24 = sadd.s32 1, %s982_s21   ;;  %s29_s25 = sadd.s32 1, %s978_s20 }
   0x8   : > { %s26_s26 = ssub.s32 %s982_s21, %s1052_s24  ;;  %p36_p0 = scmp.ne.s32.totalorder %s978_s20, %s974_s19 }
   0x9   : > { %p27_p1 = scmp.eq.s32.totalorder %s26_s26, 0  ;;  %p37_p2 = scmp.eq.s32.totalorder %s982_s21, 0 }
   0xa   : > { %p42_p3 = scmp.ne.s32.totalorder %s974_s19, %s970_s18  ;;  %p1255_p4 = scmp.eq.s32.totalorder %s1048_s22, 0 }
   0xb   : > { %s1064_s27 = scalar_select %p27_p1, %s978_s20, %s29_s25  }
   0xc   : > { %p1066_p5 = por %p37_p2, %p36_p0  ;;  %p1072_p6 = por %p1255_p4, %p42_p3 }
   0xd   : > { %p150_p7 = scmp.eq.s32.totalorder %s1048_s22, 1  ;;  %p156_p8 = scmp.eq.s32.totalorder %s673_s23, 1 }
   0xe   : > { %s1258_s29 = scalar_select %p1072_p6, 1, 0 }
   0xf   : > { %p674_p9 = scmp.ge.s32.totalorder %s982_s21, 1  ;;  %p163_p10 = scmp.lt.s32.totalorder %s982_s21, 3 }
  0x10   : > { %p1079_p11 = por %p150_p7, %p36_p0  ;;  %p1083_p12 = por %p156_p8, %p42_p3 }
  0x11   : > { %p1087_p13 = pnand %p674_p9, %p163_p10  ;;  %s984_s8 = smov [#allocation5]  }
  0x12   : > { %s1259_s30 = scalar_select %p1079_p11, 1, 0 }
  0x13   : > { %s1260_s6 = scalar_select %p1083_p12, 1, 0 }
  0x14   : > { %p755_p1 = pneg %p1087_p13  ;;  %s175_s9 = sshll.u32 %s984_s8, 4  ;;  %s176_s9 = int_to_ptr.vmem [resolvable:$true] %s175_s9 }
  0x15   : > { %s985_s11 = smov [#allocation7]   ;;  %s847_s13 = scalar_lea.vmem %s176_s9, 512 }
  0x16   : > { %p1095_p2 = pnand %p755_p1, %p1255_p4  ;;  %s191_s12 = sshll.u32 %s985_s11, 4  ;;  %s192_s12 = int_to_ptr.vmem [resolvable:$true] %s191_s12 }
  0x17   : > { %p848_p3 = scmp.ne.s32.totalorder %s176_s9, %s847_s13  ;;  %p855_p9 = scmp.lt.s32.totalorder %s176_s9, %s176_s9 }
  0x18   : > { %p838_p0 = pneg %p1095_p2  ;;  %p856_p10 = scmp.lt.s32.totalorder %s847_s13, %s847_s13 }
  0x1a   : > { %p850_p7 = pnand %p848_p3, %p838_p0  ;;  %p857_p12 = por %p856_p10, %p855_p9 }
  0x1c   : > { %p851_p8 = pneg %p850_p7 }
  0x1e   : > { %p858_p1 = pnand %p857_p12, %p851_p8 }
  0x20   : > { %861 = shalt.err (!%p858_p1)
}
  0x21   : > { %s986_s14 = smov 128   ;;  %s987_s15 = smov 8  }
  0x22   : > { %758 = dma.hbm_to_vmem [thread:$0]  (!%p1095_p2), %s1250_s1, 512, %s176_s9, [#allocation6], %s986_s14, %s986_s14, %s987_s15  }
  0x23   : > { %s873_s23 = scalar_lea.vmem %s192_s12, 2048  ;;  %p881_p11 = scmp.lt.s32.totalorder %s192_s12, %s192_s12 }
  0x24   : > { %p874_p4 = scmp.ne.s32.totalorder %s192_s12, %s873_s23  ;;  %p882_p6 = scmp.lt.s32.totalorder %s873_s23, %s873_s23 }
  0x26   : > { %p876_p3 = pnand %p874_p4, %p838_p0  ;;  %p883_p9 = por %p882_p6, %p881_p11 }
  0x28   : > { %p877_p7 = pneg %p876_p3 }
  0x2a   : > { %p884_p12 = pnand %p883_p9, %p877_p7 }
  0x2c   : > { %887 = shalt.err (!%p884_p12)
}
  0x2d   : > { %s988_s25 = smov 64   ;;  %s989_s26 = smov 4  }
  0x2e   : > { %761 = dma.hbm_to_vmem [thread:$0]  (!%p1095_p2), %s1252_s3, 2048, %s192_s12, [#allocation6], %s988_s25, %s988_s25, %s989_s26  }
  0x2f   : > { %p677_p8 = scmp.ge.s32.totalorder %s982_s21, 2 }
  0x31   : > { %204 = sbr.rel (%p677_p8) target bundleno = 86 (0x56), region = 32 }
  0x36   : > { %207 = sbr.rel (!%p1066_p5) target bundleno = 86 (0x56), region = 36  ;;  %s208_s9 = sand.u32 (%p1066_p5), 1, %s978_s20  }
  0x37   : > { %s679_s13 = sshll.u32 (%p1066_p5), %s982_s21, 1  ;;  %s678_s14 = sshll.u32 (%p1066_p5), %s208_s9, 4 }
  0x38   : > { %s214_s15 = ssub.s32 (%p1066_p5), 3, %s679_s13  ;;  %s1127_s16 = scalar_lea.sflag (%p1066_p5), [#allocation3], %s208_s9 }
  0x39   : > { %p215_p4 = scmp.lt.s32.totalorder (%p1066_p5), %s214_s15, 2  ;;  %s212_s17 = scalar_lea.vmem (%p1066_p5), [#allocation2], %s678_s14 }
  0x3b   : > { %s1273_s15 = smov (!%p215_p4, %s214_s15), 2 }
  0x3c   : > { %s1124_s10 = sshll.u32 %s1273_s15, 7 }
  0x3d   : > { %s219_s12 = ssub.s32 256, %s1124_s10 }
  0x3e   : > { %220 = vsyncadd %s1127_s16, %s219_s12  ;;  %p681_p5 = scmp.ne.s32.totalorder %s1124_s10, 0  ;;  %s721_s28 = sshll.u32 %s982_s21, 8 }
  0x3f   : > { %s1135_s26 = scalar_lea.hbm %s1249_s0, %s721_s28  ;;  %s225_s8 = sshll.u32 %s212_s17, 4  ;;  %s1137_s8 = int_to_ptr.vmem [resolvable:$true] %s225_s8 }
  0x40   : > { %s888_s11 = scalar_lea.hbm %s1135_s26, %s1124_s10  ;;  %s892_s14 = scalar_lea.hbm %s1249_s0, 384 }
  0x41   : > { %p889_p6 = scmp.ne.s32.totalorder %s1135_s26, %s888_s11  ;;  %p893_p0 = scmp.lt.s32.totalorder %s1135_s26, %s1249_s0 }
  0x42   : > { %p894_p10 = scmp.lt.s32.totalorder %s892_s14, %s888_s11 }
  0x43   : > { %p890_p11 = pnand %p889_p6, %p681_p5 }
  0x44   : > { %p895_p1 = por %p894_p10, %p893_p0 }
  0x45   : > { %p891_p2 = pneg %p890_p11 }
  0x47   : > { %p896_p3 = pnand %p895_p1, %p891_p2 }
  0x49   : > { %899 = shalt.err (!%p896_p3)
}
  0x4a   : > { %s900_s17 = scalar_lea.vmem %s1137_s8, %s1124_s10  ;;  %s990_s28 = smov [#allocation2]  }
  0x4b   : > { %p901_p7 = scmp.ne.s32.totalorder %s1137_s8, %s900_s17  ;;  %s904_s23 = sshll.u32 %s990_s28, 4  ;;  %s905_s23 = int_to_ptr.vmem [resolvable:$false] %s904_s23 }
  0x4c   : > { %s906_s25 = scalar_lea.vmem %s905_s23, 512  ;;  %p907_p4 = scmp.lt.s32.totalorder %s1137_s8, %s905_s23 }
  0x4d   : > { %p902_p9 = pnand %p901_p7, %p681_p5  ;;  %p908_p6 = scmp.lt.s32.totalorder %s906_s25, %s900_s17 }
  0x4f   : > { %p903_p12 = pneg %p902_p9  ;;  %p909_p11 = por %p908_p6, %p907_p4 }
  0x51   : > { %p910_p0 = pnand %p909_p11, %p903_p12 }
  0x53   : > { %913 = shalt.err (!%p910_p0)
}
  0x54   : > { %s991_s11 = smov 128   ;;  %s992_s9 = smov 8  }
  0x55   : > { %231 = dma.hbm_to_vmem [thread:$0]  (%p681_p5), %s1135_s26, %s1124_s10, %s1137_s8, %s1127_s16, %s991_s11, %s991_s11, %s992_s9  }
  0x56 PF: > { %237 = sbr.rel (%p1087_p13) target bundleno = 543 (0x21f), region = 40  ;;  %s1166_s13 = sand.u32 (!%p1087_p13), 1, %s974_s19  }
  0x57   : > { %s686_s14 = sshll.u32 (!%p1087_p13), %s1166_s13, 4  ;;  %s240_s15 = scalar_lea.sflag (!%p1087_p13), [#allocation3], %s1166_s13 }
  0x58   : > { %s243_s12 = scalar_lea.vmem (!%p1087_p13), [#allocation2], %s686_s14  ;;  %p1263_p2 = scmp.ne.s32.totalorder (!%p1087_p13), %s1258_s29, 0 }
  0x5b   : > { %957 = dma.done.wait (%p1263_p2), %s240_s15, 256  }
  0x5c   : > { %959 = vsyncadd (%p1263_p2), %s240_s15, 4294967040  ;;  %p1264_p5 = scmp.eq.s32.totalorder %s1048_s22, 0 }
  0x5e   : > { %961 = dma.done.wait (%p1264_p5), [#allocation6], 2560   ;;  %p1265_p13 = pmov %p1264_p5 }
  0x5f   : > { %v993_v0 = vmov 0   ;;  %v814_v1 = vld [vmem:[#allocation5 + $0x14] ss:$8 sps:$4 sm:$0xff]   ;;  %v816_v2 = vld [vmem:[#allocation5 + $0x10] ss:$8 sps:$4 sm:$0xff]   ;;  %vm328_vm0 = vcmask 261120   ;;  %v298_v24 = vlaneseq }
  0x60   : > { %963 = vsyncadd (%p1265_p13), [#allocation6], 4294964736  ;;  %364 = vmatprep.mubr.bf16.mxu0 %v993_v0  ;;  %344 = vmatprep.subr.bf16.mxu0 %v814_v1  ;;  %v817_v3 = vld [vmem:[#allocation5 + $0x4] ss:$8 sps:$4 sm:$0xff]   ;;  %v819_v4 = vld [vmem:[#allocation5] ss:$8 sps:$4 sm:$0xff]  }
  0x61   : > { %v289_v5 = vld [vmem:[%s243_s12] sm:$0xff]  ;;  %345 = vmatpush1.bf16.msra.mxu0 %v816_v2  ;;  %v290_v6 = vld [vmem:[%s243_s12 + $0x8] sm:$0xff]  ;;  %v299_v25 = vshrl.u32 %v298_v24, 7  ;;  %s277_s26 = scalar_lea.vmem [#allocation8], %s686_s14  ;;  %s562_s8 = scalar_lea.sflag [#allocation4], %s1166_s13 }
  0x62   : > { %346 = vmatprep.subr.bf16.mxu0 %v817_v3  ;;  %v820_v7 = vld [vmem:[#allocation7 + $0x78] sm:$0xff]   ;;  %v291_v9 = vpack.c.bf16 %v290_v6, %v289_v5  ;;  %v822_v10 = vld [vmem:[#allocation7 + $0x70] sm:$0xff]   ;;  %v824_v12 = vld [vmem:[#allocation7 + $0x68] sm:$0xff]   ;;  %p1266_p10 = scmp.ne.s32.totalorder %s1259_s30, 0 }
  0x63   : > { %v821_v8 = vld [vmem:[#allocation7 + $0x38] sm:$0xff]   ;;  %723 = vmatprep.subr.bf16.mxu1 %v820_v7  ;;  %v823_v11 = vld [vmem:[#allocation7 + $0x30] sm:$0xff]   ;;  %v825_v13 = vld [vmem:[#allocation7 + $0x28] sm:$0xff]   ;;  %v304_v26 = vsub.s32 1, %v299_v25  ;;  %v300_v27 = vsub.s32 0, %v299_v25  ;;  %s713_s17 = sshll.u32 (%p1266_p10), %s1048_s22, 1 }
  0x64   : > { %724 = vmatpush3.bf16.msra.mxu1 %v821_v8  ;;  %v826_v14 = vld [vmem:[#allocation7 + $0x60] sm:$0xff]   ;;  %v828_v16 = vld [vmem:[#allocation7 + $0x58] sm:$0xff]   ;;  %v830_v18 = vld [vmem:[#allocation7 + $0x50] sm:$0xff]   ;;  %s570_s28 = ssub.s32 (%p1266_p10), 3, %s713_s17 }
  0x65   : > { %347 = vmatpush1.bf16.msra.mxu0 %v819_v4  ;;  %725 = vmatprep.subr.bf16.mxu1 %v822_v10  ;;  %v827_v15 = vld [vmem:[#allocation7 + $0x20] sm:$0xff]   ;;  %v829_v17 = vld [vmem:[#allocation7 + $0x18] sm:$0xff]   ;;  %v831_v19 = vld [vmem:[#allocation7 + $0x10] sm:$0xff]   ;;  %p571_p1 = scmp.lt.s32.totalorder (%p1266_p10), %s570_s28, 2 }
  0x66   : > { %v832_v20 = vld [vmem:[#allocation7 + $0x48] sm:$0xff]   ;;  %v834_v22 = vld [vmem:[#allocation7 + $0x40] sm:$0xff]  }
  0x67   : > { %v833_v21 = vld [vmem:[#allocation7 + $0x8] sm:$0xff]   ;;  %v835_v23 = vld [vmem:[#allocation7] sm:$0xff]  }
  0x68   : > { %694 = vmatmul.mubr.msk.bf16.vlgmr.msra.gmra.mxu0 %vm328_vm0, %v291_v9  ;;  %726 = vmatpush3.bf16.msra.mxu1 %v823_v11  ;;  %v296_v28 = vld [vmem:[%s1251_s2] sm:$0x3] }
  0x69   : > { %727 = vmatprep.subr.bf16.mxu1 %v824_v12  ;;  %v305_v30 = vrot.slane %v296_v28, %v304_v26  ;;  %v301_v31 = vrot.slane %v296_v28, %v300_v27  ;;  %v695_v46 = vld [vmem:[%s1253_s4] ss:$0 sm:$0xff] }
  0x6c   : > { %728 = vmatpush3.bf16.msra.mxu1 %v825_v13 }
  0x6d   : > { %729 = vmatprep.subr.bf16.mxu1 %v826_v14 }
  0x70   : > { %730 = vmatpush3.bf16.msra.mxu1 %v827_v15 }
  0x71   : > { %731 = vmatprep.subr.bf16.mxu1 %v828_v16 }
  0x74   : > { %732 = vmatpush3.bf16.msra.mxu1 %v829_v17 }
  0x75   : > { %733 = vmatprep.subr.bf16.mxu1 %v830_v18 }
  0x78   : > { %734 = vmatpush3.bf16.msra.mxu1 %v831_v19 }
  0x79   : > { %735 = vmatprep.subr.bf16.mxu1 %v832_v20 }
  0x7c   : > { %736 = vmatpush3.bf16.msra.mxu1 %v833_v21 }
  0x7d   : > { %737 = vmatprep.subr.bf16.mxu1 %v834_v22 }
  0x80   : > { %738 = vmatpush3.bf16.msra.mxu1 %v835_v23 }
 0x128   : > { %v366_v29 = vpop.f32.mrf.mxu0 }
 0x129   : > { %v367_v36 = vadd.f32 %v366_v29, %v301_v31 }
 0x12a   : > { %v368_v32 = vpop.f32.mrf.mxu0 }
 0x12b   : > { %v369_v34 = vadd.f32 %v368_v32, %v305_v30  ;;  %v375_v42 = vmax.f32 %v367_v36, 0.0 }
 0x12c   : > { %v370_v33 = vpop.f32.mrf.mxu0 }
 0x12d   : > { %v371_v35 = vadd.f32 %v370_v33, %v301_v31  ;;  %v376_v40 = vmax.f32 %v369_v34, 0.0 }
 0x12e   : > { %v372_v37 = vpop.f32.mrf.mxu0 }
 0x12f   : > { %v373_v38 = vadd.f32 %v372_v37, %v305_v30  ;;  %v377_v39 = vmax.f32 %v371_v35, 0.0 }
 0x131   : > { %v378_v41 = vmax.f32 %v373_v38, 0.0  ;;  %v379_v44 = vpack.c.bf16 %v377_v39, %v375_v42 }
 0x133   : > { %v380_v43 = vpack.c.bf16 %v378_v41, %v376_v40 }
 0x135   : > { %548 = vmatprep.mubr.bf16.mxu1 %v380_v43 }
 0x136   : > { %549 = vmatmul.mubr.bf16.vlgmr.msra.gmra.mxu1 %v379_v44 }
 0x1f6   : > { %v739_v45 = vpop.f32.mrf.mxu1 }
 0x1f8   : > { %v740_v47 = vpop.f32.mrf.mxu1 }
 0x1f9   : > { %v741_v48 = vadd.f32 %v740_v47, %v739_v45 }
 0x1fa   : > { %v742_v49 = vpop.f32.mrf.mxu1 }
 0x1fb   : > { %v551_v50 = vadd.f32 %v741_v48, %v695_v46 }
 0x1fc   : > { %v743_v51 = vpop.f32.mrf.mxu1 }
 0x1fd   : > { %v557_v52 = vmax.f32 %v551_v50, 0.0  ;;  %v744_v53 = vadd.f32 %v743_v51, %v742_v49 }
 0x1ff   : > { %559 = vst [vmem:[%s277_s26] sm:$0xff] %v557_v52  ;;  %v554_v54 = vadd.f32 %v744_v53, %v695_v46  ;;  %568 = sbr.rel (!%p1266_p10) target bundleno = 543 (0x21f), region = 56 }
 0x201   : > { %v558_v55 = vmax.f32 %v554_v54, 0.0 }
 0x203   : > { %560 = vst [vmem:[%s277_s26 + $0x8] sm:$0xff] %v558_v55 }
 0x204   : > { %s1275_s28 = smov (!%p571_p1, %s570_s28), 2 }
 0x205   : > { %s1192_s23 = sshll.u32 %s1275_s28, 7 }
 0x206   : > { %s575_s25 = ssub.s32 256, %s1192_s23 }
 0x207   : > { %576 = vsyncadd %s562_s8, %s575_s25  ;;  %p715_p3 = scmp.ne.s32.totalorder %s1192_s23, 0  ;;  %s722_s11 = sshll.u32 %s1048_s22, 8 }
 0x208   : > { %s1202_s14 = scalar_lea.hbm %s1254_s5, %s722_s11  ;;  %s581_s15 = sshll.u32 %s277_s26, 4  ;;  %s1204_s15 = int_to_ptr.vmem [resolvable:$true] %s581_s15 }
 0x209   : > { %s914_s12 = scalar_lea.vmem %s1204_s15, %s1192_s23  ;;  %s994_s29 = smov [#allocation8]  }
 0x20a   : > { %p915_p7 = scmp.ne.s32.totalorder %s1204_s15, %s914_s12  ;;  %s918_s7 = sshll.u32 %s994_s29, 4  ;;  %s919_s7 = int_to_ptr.vmem [resolvable:$false] %s918_s7 }
 0x20b   : > { %s920_s22 = scalar_lea.vmem %s919_s7, 512  ;;  %p921_p4 = scmp.lt.s32.totalorder %s1204_s15, %s919_s7 }
 0x20c   : > { %p916_p9 = pnand %p915_p7, %p715_p3  ;;  %p922_p6 = scmp.lt.s32.totalorder %s920_s22, %s914_s12 }
 0x20e   : > { %p917_p12 = pneg %p916_p9  ;;  %p923_p11 = por %p922_p6, %p921_p4 }
 0x210   : > { %p924_p0 = pnand %p923_p11, %p917_p12 }
 0x212   : > { %927 = shalt.err (!%p924_p0)
}
 0x213   : > { %s928_s10 = scalar_lea.hbm %s1202_s14, %s1192_s23  ;;  %s932_s17 = scalar_lea.hbm %s1254_s5, 384 }
 0x214   : > { %p929_p2 = scmp.ne.s32.totalorder %s1202_s14, %s928_s10  ;;  %p933_p10 = scmp.lt.s32.totalorder %s1202_s14, %s1254_s5 }
 0x215   : > { %p934_p1 = scmp.lt.s32.totalorder %s932_s17, %s928_s10 }
 0x216   : > { %p930_p5 = pnand %p929_p2, %p715_p3 }
 0x217   : > { %p935_p7 = por %p934_p1, %p933_p10 }
 0x218   : > { %p931_p13 = pneg %p930_p5 }
 0x21a   : > { %p936_p9 = pnand %p935_p7, %p931_p13 }
 0x21c   : > { %939 = shalt.err (!%p936_p9)
}
 0x21d   : > { %s995_s11 = smov 128   ;;  %s996_s30 = smov 8  }
 0x21e   : > { %587 = dma.vmem_to_hbm [thread:$0]  (%p715_p3), %s1204_s15, %s1192_s23, %s1202_s14, %s562_s8, %s995_s11, %s995_s11, %s996_s30  }
 0x21f PF: > { %s596_s9 = sand.u32 1, %s970_s18   ;;  %p1267_p12 = scmp.ne.s32.totalorder %s1260_s6, 0 }
 0x220   : > { %s597_s12 = scalar_lea.sflag [#allocation4], %s596_s9 }
 0x221   : > { %p763_p4 = pnand %p677_p8, %p1267_p12 }
 0x223   : > { %p764_p6 = pneg %p763_p4 }
 0x225   : > { %965 = dma.done.wait (%p764_p6), %s597_s12, 256  }
 0x226   : > { %967 = vsyncadd (%p764_p6), %s597_s12, 4294967040  ;;  %p19_p11 = scmp.ge.s32.totalorder %s1052_s24, 4   ;;  %s1268_s18 = smov %s974_s19 }
 0x227   : > { %s1269_s19 = smov %s978_s20  ;;  %s1270_s20 = smov %s1064_s27 }
 0x228   : > { %s1271_s21 = smov %s1052_s24  ;;  %21 = sbr.rel (!%p19_p11) target bundleno = 6 (0x6), region = 93 }
 0x22d   :  { %602 = vsyncpa [#allocation3], 1 }
 0x22e   :  { %604 = vsyncpa [#allocation3 + $0x1], 1 }
 0x22f   :  { %605 = vsyncpa [#allocation6], 1 }
 0x230   :  { %606 = vsyncpa [#allocation4], 1 }
 0x231   :  { %608 = vsyncpa [#allocation4 + $0x1], 1 }

</bundles_post_ra>
